<compile_context>
chip_gen: v5e
topology: v5e:2x2
jax: 0.10.0
libtpu: 0.0.40
codegen_flags: <defaults>
</compile_context>

<pallas_src>
import math
from functools import partial

import jax
import jax.numpy as jnp
from jax.experimental import pallas as pl
from jax.experimental.pallas import tpu as pltpu


# ---------------------------------------------------------------------------
# helpers
# ---------------------------------------------------------------------------
_VMEM_LIMIT_BYTES = 32 * 1024 * 1024     # safe on v7x (64 MiB physical), > v5e/v6e defaults
_TILE_TARGET_BYTES = 2 << 20             # ~2 MiB blocks: amortizes ~0.35 us per grid step


def _cdiv(a, b):
    return (a + b - 1) // b


def _round_up(x, m):
    return ((x + m - 1) // m) * m


def _cparams(dims):
    return pltpu.CompilerParams(dimension_semantics=dims,
                                vmem_limit_bytes=_VMEM_LIMIT_BYTES)


def _pick_row_tile(rows, row_bytes, target_bytes=_TILE_TARGET_BYTES):
    """Row tile: multiple of 8, ~target_bytes per block, >=2 grid steps when possible
    (keeps both v7x TensorCores busy via the 'parallel' grid axis)."""
    t = max(8, (target_bytes // max(row_bytes, 1)) // 8 * 8)
    half = _round_up(_cdiv(rows, 2), 8)
    return max(8, min(t, half, _round_up(rows, 8)))


# ---------------------------------------------------------------------------
# matmul:  out = A @ B  with K, N taken as single full-dim blocks (RoPE head dims
# are small), M streamed in large row tiles.  Optionally emits per-tile |out| max
# (fused amax for the per-tensor act-quant path).
# ---------------------------------------------------------------------------
def _mm_kernel(a_ref, b_ref, o_ref):
    o_ref[...] = jnp.dot(a_ref[...], b_ref[...],
                         preferred_element_type=jnp.float32).astype(o_ref.dtype)


def _mm_amax_kernel(a_ref, b_ref, o_ref, amax_ref, *, m_total, tm):
    acc = jnp.dot(a_ref[...], b_ref[...], preferred_element_type=jnp.float32)
    o_ref[...] = acc.astype(o_ref.dtype)
    a = jnp.abs(acc)
    if m_total % tm != 0:
        # mask garbage rows of the partial edge block out of the |max|
        rows = (jax.lax.broadcasted_iota(jnp.int32, acc.shape, 0)
                + pl.program_id(0) * tm)
        a = jnp.where(rows < m_total, a, 0.0)
    amax_ref[...] = jnp.broadcast_to(jnp.max(a), amax_ref.shape)


def pallas_matmul(a, b, *, out_dtype=None, with_amax=False):
    """C = A @ B. No K/N padding; M tail handled by a masked partial edge block."""
    M, K = a.shape
    K2, N = b.shape
    assert K == K2, (a.shape, b.shape)
    out_dtype = out_dtype or a.dtype

    if K > 2048 or N > 2048:
        # TODO(synk): general K/N-tiled path not needed for RoPE head dims; fall back to XLA.
        out = jnp.dot(a, b, preferred_element_type=jnp.float32).astype(out_dtype)
        return (out, jnp.max(jnp.abs(out))) if with_amax else out

    tm = _pick_row_tile(M, max(K, N) * 4)
    grid = (_cdiv(M, tm),)

    in_specs = [pl.BlockSpec((tm, K), lambda i: (i, 0)),
                pl.BlockSpec((K, N), lambda i: (0, 0))]   # B resident across the grid
    out_spec_o = pl.BlockSpec((tm, N), lambda i: (i, 0))

    if not with_amax:
        return pl.pallas_call(
            _mm_kernel,
            out_shape=jax.ShapeDtypeStruct((M, N), out_dtype),
            grid_spec=pltpu.PrefetchScalarGridSpec(
                num_scalar_prefetch=0, grid=grid,
                in_specs=in_specs, out_specs=out_spec_o),
            compiler_params=_cparams(("parallel",)),
        )(a, b)

    out, amax_tiles = pl.pallas_call(
        partial(_mm_amax_kernel, m_total=M, tm=tm),
        out_shape=(jax.ShapeDtypeStruct((M, N), out_dtype),
                   jax.ShapeDtypeStruct((grid[0] * 8, 128), jnp.float32)),
        grid_spec=pltpu.PrefetchScalarGridSpec(
            num_scalar_prefetch=0, grid=grid,
            in_specs=in_specs,
            out_specs=(out_spec_o,
                       pl.BlockSpec((8, 128), lambda i: (i, 0)))),
        compiler_params=_cparams(("parallel",)),
    )(a, b)
    return out, jnp.max(amax_tiles)


# ---------------------------------------------------------------------------
# symmetric dynamic fake quantization (apply passes)
# ---------------------------------------------------------------------------
def _apply_pertensor_kernel(x_ref, scales_ref, o_ref, *, bits):
    qmax = float(2 ** (bits - 1) - 1)
    qmin = -float(2 ** (bits - 1))
    scale = scales_ref[0]          # SMEM scalars: [scale, 1/scale]
    inv = scales_ref[1]
    x = x_ref[...].astype(jnp.float32)
    q = jnp.clip(jnp.round(x * inv), qmin, qmax)
    o_ref[...] = (q * scale).astype(o_ref.dtype)


def pertensor_apply(x2d, scale, *, bits=8):
    """Apply per-tensor symmetric fake quant to a 2D view with a precomputed scale."""
    rows, width = x2d.shape
    t = _pick_row_tile(rows, width * 4)
    scales = jnp.stack([scale, 1.0 / scale]).astype(jnp.float32)
    return pl.pallas_call(
        partial(_apply_pertensor_kernel, bits=bits),
        out_shape=jax.ShapeDtypeStruct((rows, width), x2d.dtype),
        grid_spec=pltpu.PrefetchScalarGridSpec(
            num_scalar_prefetch=0, grid=(_cdiv(rows, t),),
            in_specs=[pl.BlockSpec((t, width), lambda i: (i, 0)),
                      pl.BlockSpec(memory_space=pltpu.MemorySpace.SMEM)],
            out_specs=pl.BlockSpec((t, width), lambda i: (i, 0))),
        compiler_params=_cparams(("parallel",)),
    )(x2d, scales)


def _apply_pertoken_kernel(x_ref, o_ref, *, bits):
    qmax = float(2 ** (bits - 1) - 1)
    qmin = -float(2 ** (bits - 1))
    x = x_ref[...].astype(jnp.float32)
    amax = jnp.max(jnp.abs(x), axis=-1, keepdims=True)     # per-token |x| max
    scale = jnp.maximum(amax, 1e-8) * (1.0 / qmax)
    inv = 1.0 / scale                                       # exact; one per row only
    q = jnp.clip(jnp.round(x * inv), qmin, qmax)
    o_ref[...] = (q * scale).astype(o_ref.dtype)


def pertoken_fake_quant(x2d, *, bits=8):
    """Per-token (last axis) symmetric dynamic fake quant on (tokens, features)."""
    rows, width = x2d.shape
    t = _pick_row_tile(rows, width * 4)
    return pl.pallas_call(
        partial(_apply_pertoken_kernel, bits=bits),
        out_shape=jax.ShapeDtypeStruct((rows, width), x2d.dtype),
        grid_spec=pltpu.PrefetchScalarGridSpec(
            num_scalar_prefetch=0, grid=(_cdiv(rows, t),),
            in_specs=[pl.BlockSpec((t, width), lambda i: (i, 0))],
            out_specs=pl.BlockSpec((t, width), lambda i: (i, 0))),
        compiler_params=_cparams(("parallel",)),
    )(x2d)


# ---------------------------------------------------------------------------
# tiny weight-side fake quant (64x64 / 128x128) -> plain XLA per the perf review
# ---------------------------------------------------------------------------
def _jnp_fq_pertensor(x, bits=8):
    qmax = float(2 ** (bits - 1) - 1)
    qmin = -float(2 ** (bits - 1))
    scale = jnp.maximum(jnp.max(jnp.abs(x)), 1e-8) / qmax
    return jnp.clip(jnp.round(x / scale), qmin, qmax) * scale


# ---------------------------------------------------------------------------
# QuantROPE.forward
# ---------------------------------------------------------------------------
def quant_rope_forward(x, Wrope, pre_rope_Q=None, post_rope_Q=None, *,
                       use_weight_quant=False, use_act_quant=False,
                       rope_bits=8, act_bits=8,
                       act_dynamic_method="pertensor"):
    """Pallas port of QuantROPE.forward.

    x      : (b, l, h, k)  activations
    Wrope  : (k, n)        RoPE rotation / mixing matrix (applied per head)
    """
    # weight-side rotations + weight fake-quant: tiny head_dim x head_dim work -> XLA
    if pre_rope_Q is not None:
        Wrope = pre_rope_Q.T.astype(jnp.float32) @ Wrope.astype(jnp.float32)
    if post_rope_Q is not None:
        Wrope = Wrope.astype(jnp.float32) @ post_rope_Q.astype(jnp.float32)
    if use_weight_quant:
        Wrope = _jnp_fq_pertensor(Wrope, bits=rope_bits)

    b, l, h, d = x.shape
    K = d
    N = Wrope.shape[-1]
    a2d = x.reshape(b * l * h, K)
    W = Wrope.astype(x.dtype)

    if use_act_quant and act_dynamic_method == "pertensor":
        # amax fused into the matmul epilogue -> no extra read of `out`
        out2d, amax = pallas_matmul(a2d, W, with_amax=True)
        qmax = float(2 ** (act_bits - 1) - 1)
        scale = jnp.maximum(amax, 1e-8) / qmax
        out_wide = pertensor_apply(out2d.reshape(b * l, h * N), scale, bits=act_bits)
        return out_wide.reshape(b, l, h, N)

    out2d = pallas_matmul(a2d, W)
    out = out2d.reshape(b, l, h, N)
    if use_act_quant:  # 'pertoken' on the (b, l, h*d) view, as the module reshapes
        out = pertoken_fake_quant(out.reshape(b * l, h * N),
                                  bits=act_bits).reshape(b, l, h, N)
    return out


# ---------------------------------------------------------------------------
# pure-JAX reference
# ---------------------------------------------------------------------------
def _ref_fq_pertensor(x, bits=8):
    qmax = float(2 ** (bits - 1) - 1)
    qmin = -float(2 ** (bits - 1))
    scale = jnp.maximum(jnp.max(jnp.abs(x)), 1e-8) / qmax
    return jnp.clip(jnp.round(x / scale), qmin, qmax) * scale


def _ref_fq_pertoken(x2d, bits=8):
    qmax = float(2 ** (bits - 1) - 1)
    qmin = -float(2 ** (bits - 1))
    scale = jnp.maximum(jnp.max(jnp.abs(x2d), axis=-1, keepdims=True), 1e-8) / qmax
    return jnp.clip(jnp.round(x2d / scale), qmin, qmax) * scale


def _ref_forward(x, W, pre_Q=None, post_Q=None, use_weight_quant=False,
                 use_act_quant=False, act_dynamic_method="pertensor"):
    if pre_Q is not None:
        W = pre_Q.T.astype(jnp.float32) @ W.astype(jnp.float32)
    if post_Q is not None:
        W = W.astype(jnp.float32) @ post_Q.astype(jnp.float32)
    if use_weight_quant:
        W = _ref_fq_pertensor(W)
    out = jnp.einsum("blhk,kn->blhn", x, W.astype(x.dtype),
                     precision=jax.lax.Precision.HIGHEST)
    if use_act_quant:
        b, l, h, d = out.shape
        if act_dynamic_method == "pertoken":
            out = _ref_fq_pertoken(out.reshape(b * l, h * d)).reshape(b, l, h, d)
        else:
            out = _ref_fq_pertensor(out)
    return out


# ---------------------------------------------------------------------------
# demo / smoke test
# ---------------------------------------------------------------------------
if __name__ == "__main__":
    key = jax.random.PRNGKey(0)
    kx, kw, kq1, kq2 = jax.random.split(key, 4)

    b, l, h, d = 2, 8, 4, 64
    x = jax.random.normal(kx, (b, l, h, d), dtype=jnp.float32)
    Wrope = jax.random.normal(kw, (d, d), dtype=jnp.float32) / math.sqrt(d)

    # A) default config: plain matmul, no quant, no hadamard
    y = quant_rope_forward(x, Wrope)
    jax.block_until_ready(y)
    ref = _ref_forward(x, Wrope)
    assert y.shape == (b, l, h, d)
    assert jnp.allclose(y, ref, atol=1e-2, rtol=1e-2)

    quant_step = float(jnp.max(jnp.abs(ref))) / 127.0  # one 8-bit quant step

    # B) use_act_quant=True with the module-default 'pertensor' quantizer
    yq = quant_rope_forward(x, Wrope, use_act_quant=True)
    jax.block_until_ready(yq)
    refq = _ref_forward(x, Wrope, use_act_quant=True)
    assert float(jnp.max(jnp.abs(yq - refq))) <= 1.5 * quant_step + 1e-2

    # C) 'pertoken' act quant (reshape (b,l,h*d) path); matmul numeric differences can
    #    flip values near rounding ties, so compare at quant-step resolution.
    yt = quant_rope_forward(x, Wrope, use_act_quant=True,
                            act_dynamic_method="pertoken")
    jax.block_until_ready(yt)
    reft = _ref_forward(x, Wrope, use_act_quant=True,
                        act_dynamic_method="pertoken")
    assert float(jnp.max(jnp.abs(yt - reft))) <= 2.5 * quant_step + 1e-2

    # D) pre/post RoPE rotations + weight quant
    preQ = jax.random.normal(kq1, (d, d), dtype=jnp.float32) / math.sqrt(d)
    postQ = jax.random.normal(kq2, (d, d), dtype=jnp.float32) / math.sqrt(d)
    yw = quant_rope_forward(x, Wrope, pre_rope_Q=preQ, post_rope_Q=postQ,
                            use_weight_quant=True)
    jax.block_until_ready(yw)
    refw = _ref_forward(x, Wrope, pre_Q=preQ, post_Q=postQ, use_weight_quant=True)
    rel = float(jnp.linalg.norm(yw - refw) / (jnp.linalg.norm(refw) + 1e-12))
    assert rel < 1e-2, rel

    print("KERNEL_OK")
</pallas_src>

<mosaic_0001>
module attributes {stable_mosaic.version = 11 : i64} {
  func.func @_mm_kernel(%arg0: i32, %arg1: memref<32x64xf32, #tpu.memory_space<vmem>>, %arg2: memref<64x64xf32, #tpu.memory_space<vmem>>, %arg3: memref<32x64xf32, #tpu.memory_space<vmem>>) attributes {dimension_semantics = [#tpu.dimension_semantics<parallel>], iteration_bounds = array<i64: 2>, scalar_prefetch = 0 : i64, scratch_operands = 0 : i64, tpu.core_type = #tpu.core_type<tc>, window_params = [{transform_indices = @transform_0, window_bounds = array<i64: 32, 64>}, {pipeline_mode = #tpu.pipeline_mode<synchronous>, transform_indices = @transform_1, window_bounds = array<i64: 64, 64>}, {transform_indices = @transform_2, window_bounds = array<i64: 32, 64>}]} {
    %c0 = arith.constant 0 : index
    %c0_0 = arith.constant 0 : index
    %0 = vector.load %arg1[%c0, %c0_0] : memref<32x64xf32, #tpu.memory_space<vmem>>, vector<32x64xf32>
    %c0_1 = arith.constant 0 : index
    %c0_2 = arith.constant 0 : index
    %1 = vector.load %arg2[%c0_1, %c0_2] : memref<64x64xf32, #tpu.memory_space<vmem>>, vector<64x64xf32>
    %cst = arith.constant dense<0.000000e+00> : vector<32x64xf32>
    %2 = tpu.matmul %0, %1, %cst {dimension_numbers = #tpu.dot_dimension_numbers<[1], [0], [0], [1], [0, 0, 1, 1], [], []>} : vector<32x64xf32>, vector<64x64xf32>, vector<32x64xf32> -> vector<32x64xf32>
    %c0_3 = arith.constant 0 : index
    %c0_4 = arith.constant 0 : index
    %3 = vector.load %arg3[%c0_3, %c0_4] : memref<32x64xf32, #tpu.memory_space<vmem>>, vector<32x64xf32>
    tpu.vector_store %arg3[%c0_3, %c0_4], %2 {strides = array<i32>} : memref<32x64xf32, #tpu.memory_space<vmem>>, vector<32x64xf32>,
    return
  }
  func.func @transform_0(%arg0: i32) -> (i32, i32) {
    %c0_i32 = arith.constant 0 : i32
    %c0_i32_0 = arith.constant 0 : i32
    return %arg0, %c0_i32 : i32, i32
  }
  func.func @transform_1(%arg0: i32) -> (i32, i32) {
    %c0_i32 = arith.constant 0 : i32
    %c0_i32_0 = arith.constant 0 : i32
    %c0_i32_1 = arith.constant 0 : i32
    return %c0_i32, %c0_i32_0 : i32, i32
  }
  func.func @transform_2(%arg0: i32) -> (i32, i32) {
    %c0_i32 = arith.constant 0 : i32
    %c0_i32_0 = arith.constant 0 : i32
    return %arg0, %c0_i32 : i32, i32
  }
}

</mosaic_0001>

<bundles_post_ra>
// kernel: tpu_custom_call.1
= control target key start
LH: loop header
LB: loop body
LE: loop exit
PB: predicated region body
PF: predicated region fallthrough
CT: control target
= control target key end

     0   :  { %7 = vsyncpa [#allocation3], 0  ;;  %s761_s0 = inlined_call_operand.hbm [shape: f32[64,64], index: 0, kind: input, shape index: {}]   ;;  %s762_s1 = inlined_call_operand.hbm [shape: f32[64,64], index: 1, kind: input, shape index: {}]   ;;  %s763_s2 = inlined_call_operand.hbm [shape: f32[64,64], index: 2, kind: output, shape index: {}]  }
   0x1   :  { %9 = vsyncpa [#allocation3 + $0x1], 0 }
   0x2   :  { %10 = vsyncpa [#allocation6], 0 }
   0x3   :  { %11 = vsyncpa [#allocation4], 0 }
   0x4   :  { %13 = vsyncpa [#allocation4 + $0x1], 0  ;;  %s599_s9 = smov 0   ;;  %s601_s10 = smov 0  }
   0x5   :  { %s603_s11 = smov 0   ;;  %s605_s12 = smov 0  }
   0x6 LB: > { %s620_s13 = sadd.s32 4294967295, %s577_s12   ;;  %s340_s14 = sadd.s32 4294967294, %s577_s12   ;;  %s577_s12 = sphi %s605_s12, %s773_s12   ;;  %s573_s11 = sphi %s603_s11, %s772_s11   ;;  %s569_s10 = sphi %s601_s10, %s771_s10   ;;  %s565_s9 = sphi %s599_s9, %s770_s9  }
   0x7   : > { %p39_p0 = scmp.ne.s32.totalorder %s569_s10, %s565_s9  ;;  %p40_p1 = scmp.eq.s32.totalorder %s620_s13, 0 }
   0x8   : > { %p84_p2 = scmp.eq.s32.totalorder %s620_s13, 1  ;;  %p90_p3 = scmp.eq.s32.totalorder %s340_s14, 1 }
   0x9   : > { %p629_p4 = por %p40_p1, %p39_p0  ;;  %p341_p5 = scmp.ge.s32.totalorder %s577_s12, 1 }
   0xa   : > { %p634_p6 = por %p90_p3, %p39_p0  ;;  %p97_p7 = scmp.lt.s32.totalorder %s577_s12, 3 }
   0xb   : > { %s108_s19 = sshll.u32 %s762_s1, 4  ;;  %s579_s21 = smov [#allocation5]   ;;  %s109_s19 = int_to_ptr.hbm [resolvable:$true] %s108_s19 }
   0xc   : > { %p642_p8 = pnand %p341_p5, %p97_p7  ;;  %s110_s22 = sshll.u32 %s579_s21, 4  ;;  %s111_s22 = int_to_ptr.vmem [resolvable:$true] %s110_s22 }
   0xd   : > { %s652_s23 = sadd.s32 1, %s577_s12   ;;  %s580_s24 = smov 128  }
   0xe   : > { %p394_p9 = pneg %p642_p8  ;;  %s581_s25 = smov 8  }
   0xf   : > { %s23_s26 = ssub.s32 %s577_s12, %s652_s23  ;;  %s26_s27 = sadd.s32 1, %s573_s11 }
  0x10   : > { %p395_p10 = pnand %p394_p9, %p40_p1  ;;  %p24_p12 = scmp.eq.s32.totalorder %s23_s26, 0 }
  0x11   : > { %p33_p13 = scmp.ne.s32.totalorder %s573_s11, %s569_s10  ;;  %p34_p0 = scmp.eq.s32.totalorder %s577_s12, 0 }
  0x12   : > { %397 = dma.hbm_to_vmem [thread:$0]  (!%p395_p10), %s109_s19, 1024, %s111_s22, [#allocation6], %s580_s24, %s580_s24, %s581_s25  }
  0x13   : > { %s664_s28 = scalar_select %p24_p12, %s573_s11, %s26_s27  }
  0x14   : > { %p668_p3 = por %p84_p2, %p33_p13  ;;  %p407_p5 = scmp.lt.s32.totalorder %s577_s12, 2 }
  0x15   : > { %s124_s30 = sand.u32 1, %s573_s11   ;;  %s360_s3 = sshll.u32 %s577_s12, 5 }
  0x16   : > { %p35_p7 = por %p34_p0, %p33_p13  ;;  %s344_s4 = sshll.u32 %s124_s30, 5 }
  0x17   : > { %s133_s7 = scalar_lea.hbm %s761_s0, %s360_s3  ;;  %s128_s14 = scalar_lea.vmem [#allocation2], %s344_s4 }
  0x18   : > { %s134_s8 = sshll.u32 %s133_s7, 4  ;;  %s136_s17 = sshll.u32 %s128_s14, 4  ;;  %s135_s8 = int_to_ptr.hbm [resolvable:$true] %s134_s8  ;;  %s137_s17 = int_to_ptr.vmem [resolvable:$true] %s136_s17 }
  0x19   : > { %p678_p9 = pnand %p407_p5, %p35_p7  ;;  %s125_s19 = scalar_lea.sflag [#allocation3], %s124_s30 }
  0x1a   : > { %s477_s21 = sshra.s32 %s135_s8, 4  ;;  %s484_s3 = scalar_lea.hbm %s761_s0, 64  ;;  %s478_s21 = int_to_ptr.hbm [resolvable:$true] %s477_s21 }
  0x1b   : > { %s479_s22 = scalar_lea.hbm %s478_s21, 32  ;;  %p481_p10 = pneg %p678_p9 }
  0x1c   : > { %p480_p2 = scmp.ne.s32.totalorder %s478_s21, %s479_s22  ;;  %p485_p0 = scmp.lt.s32.totalorder %s478_s21, %s761_s0 }
  0x1d   : > { %p486_p5 = scmp.lt.s32.totalorder %s484_s3, %s479_s22 }
  0x1e   : > { %p482_p12 = pnand %p481_p10, %p480_p2 }
  0x1f   : > { %p487_p7 = por %p486_p5, %p485_p0 }
  0x20   : > { %p483_p13 = pneg %p482_p12 }
  0x22   : > { %p488_p11 = pnand %p487_p7, %p483_p13 }
  0x24   : > { %491 = shalt.err (!%p488_p11)
}
  0x25   : > { %401 = dma.hbm_to_vmem [thread:$0]  (!%p678_p9), %s135_s8, 512, %s137_s17, %s125_s19, %s580_s24, %s580_s24, %s581_s25  }
  0x26   : > { %148 = sbr.rel (%p642_p8) target bundleno = 199 (0xc7), region = 28  ;;  %s698_s30 = sand.u32 (!%p642_p8), 1, %s569_s10  }
  0x27   : > { %s348_s6 = sshll.u32 (!%p642_p8), %s698_s30, 5  ;;  %s151_s7 = scalar_lea.sflag (!%p642_p8), [#allocation3], %s698_s30 }
  0x28   : > { %s704_s14 = scalar_lea.vmem (!%p642_p8), [#allocation2], %s348_s6 }
  0x2b   : > { %552 = dma.done.wait (%p629_p4), %s151_s7, 512  }
  0x2c   : > { %554 = vsyncadd (%p629_p4), %s151_s7, 4294966784 }
  0x2d   : > { %556 = dma.done.wait (%p40_p1), [#allocation6], 1024  }
  0x2e   : > { %558 = vsyncadd (%p40_p1), [#allocation6], 4294966272  ;;  %v194_v0 = vld [vmem:[#allocation5 + $0x38] sm:$0xff]  ;;  %v193_v1 = vld [vmem:[#allocation5 + $0x30] sm:$0xff]  ;;  %vm195_vm0 = vcmask 523264   ;;  %s361_s15 = sshll.u32 %s620_s13, 5 }
  0x2f   : > { %363 = vmatpush.msra.mxu2 %v194_v0  ;;  %364 = vmatpush.msra.mxu3 %v194_v0  ;;  %v192_v2 = vld [vmem:[#allocation5 + $0x28] sm:$0xff]  ;;  %v191_v3 = vld [vmem:[#allocation5 + $0x20] sm:$0xff]  ;;  %v190_v4 = vld [vmem:[#allocation5 + $0x18] sm:$0xff]  ;;  %s253_s25 = scalar_lea.hbm %s763_s2, %s361_s15  ;;  %s180_s8 = scalar_lea.vmem [#allocation7], %s348_s6 }
  0x30   : > { %216 = vmatpush.msra.mxu0 %v194_v0  ;;  %362 = vmatpush.msra.mxu1 %v194_v0  ;;  %v189_v5 = vld [vmem:[#allocation5 + $0x10] sm:$0xff]  ;;  %v188_v6 = vld [vmem:[#allocation5 + $0x8] sm:$0xff]  ;;  %v187_v7 = vld [vmem:[#allocation5] sm:$0xff]  ;;  %s254_s17 = sshll.u32 %s180_s8, 4  ;;  %s256_s18 = sshll.u32 %s253_s25, 4  ;;  %s255_s17 = int_to_ptr.vmem [resolvable:$true] %s254_s17  ;;  %s257_s18 = int_to_ptr.hbm [resolvable:$true] %s256_s18 }
  0x31   : > { %366 = vmatpush.msra.mxu2 %v193_v1  ;;  %367 = vmatpush.msra.mxu3 %v193_v1  ;;  %v185_v8 = vld [vmem:[%s704_s14 + $0x10] sm:$0xff]  ;;  %v186_v9 = vld [vmem:[%s704_s14 + $0x18] sm:$0xff]  ;;  %v183_v10 = vld [vmem:[%s704_s14] sm:$0xff]  ;;  %s242_s13 = scalar_lea.sflag [#allocation4], %s698_s30  ;;  %s521_s19 = sshra.s32 %s257_s18, 4  ;;  %s522_s19 = int_to_ptr.hbm [resolvable:$true] %s521_s19 }
  0x32   : > { %217 = vmatpush.msra.mxu0 %v193_v1  ;;  %365 = vmatpush.msra.mxu1 %v193_v1  ;;  %v184_v11 = vld [vmem:[%s704_s14 + $0x8] sm:$0xff]  ;;  %s523_s21 = scalar_lea.hbm %s522_s19, 32  ;;  %s527_s27 = scalar_lea.hbm %s763_s2, 64 }
  0x33   : > { %369 = vmatpush.msra.mxu2 %v192_v2  ;;  %370 = vmatpush.msra.mxu3 %v192_v2  ;;  %p524_p1 = scmp.ne.s32.totalorder %s522_s19, %s523_s21  ;;  %p528_p11 = scmp.lt.s32.totalorder %s522_s19, %s763_s2 }
  0x34   : > { %218 = vmatpush.msra.mxu0 %v192_v2  ;;  %368 = vmatpush.msra.mxu1 %v192_v2  ;;  %p529_p9 = scmp.lt.s32.totalorder %s527_s27, %s523_s21 }
  0x35   : > { %372 = vmatpush.msra.mxu2 %v191_v3  ;;  %373 = vmatpush.msra.mxu3 %v191_v3  ;;  %p525_p4 = pnand %p524_p1, %p668_p3 }
  0x36   : > { %219 = vmatpush.msra.mxu0 %v191_v3  ;;  %371 = vmatpush.msra.mxu1 %v191_v3  ;;  %p530_p2 = por %p529_p9, %p528_p11 }
  0x37   : > { %375 = vmatpush.msra.mxu2 %v190_v4  ;;  %376 = vmatpush.msra.mxu3 %v190_v4  ;;  %p526_p8 = pneg %p525_p4 }
  0x38   : > { %220 = vmatpush.msra.mxu0 %v190_v4  ;;  %374 = vmatpush.msra.mxu1 %v190_v4 }
  0x39   : > { %378 = vmatpush.msra.mxu2 %v189_v5  ;;  %379 = vmatpush.msra.mxu3 %v189_v5  ;;  %p531_p10 = pnand %p530_p2, %p526_p8 }
  0x3a   : > { %221 = vmatpush.msra.mxu0 %v189_v5  ;;  %377 = vmatpush.msra.mxu1 %v189_v5 }
  0x3b   : > { %381 = vmatpush.msra.mxu2 %v188_v6  ;;  %382 = vmatpush.msra.mxu3 %v188_v6 }
  0x3c   : > { %222 = vmatpush.msra.mxu0 %v188_v6  ;;  %380 = vmatpush.msra.mxu1 %v188_v6 }
  0x3d   : > { %384 = vmatpush.msra.mxu2 %v187_v7  ;;  %385 = vmatpush.msra.mxu3 %v187_v7 }
  0x3e   : > { %353 = vmatmul.msk.f32.vlgmr.msra.gmra.mxu2 %vm195_vm0, %v185_v8  ;;  %354 = vmatmul.msk.f32.vlgmr.msra.gmra.mxu3 %vm195_vm0, %v186_v9 }
  0x3f   : > { %223 = vmatpush.msra.mxu0 %v187_v7  ;;  %383 = vmatpush.msra.mxu1 %v187_v7 }
  0x40   : > { %351 = vmatmul.msk.f32.vlgmr.msra.gmra.mxu0 %vm195_vm0, %v183_v10  ;;  %352 = vmatmul.msk.f32.vlgmr.msra.gmra.mxu1 %vm195_vm0, %v184_v11 }
  0xbd   : > { %v225_v12 = vpop.f32.mrf.mxu0  ;;  %v228_v13 = vpop.f32.mrf.mxu1 }
  0xbe   : > { %237 = vst.msk [vmem:[%s180_s8] sm:$0xff] %vm195_vm0, %v225_v12 }
  0xbf   : > { %238 = vst.msk [vmem:[%s180_s8 + $0x8] sm:$0xff] %vm195_vm0, %v228_v13 }
  0xc1   : > { %v231_v14 = vpop.f32.mrf.mxu2  ;;  %v234_v15 = vpop.f32.mrf.mxu3 }
  0xc2   : > { %239 = vst.msk [vmem:[%s180_s8 + $0x10] sm:$0xff] %vm195_vm0, %v231_v14 }
  0xc3   : > { %240 = vst.msk [vmem:[%s180_s8 + $0x18] sm:$0xff] %vm195_vm0, %v234_v15 }
  0xc4   : > { %534 = shalt.err (!%p531_p10)
}
  0xc5   : > { %s582_s5 = smov 128   ;;  %s583_s30 = smov 8  }
  0xc6   : > { %392 = dma.vmem_to_hbm [thread:$0]  (%p668_p3), %s255_s17, 512, %s257_s18, %s242_s13, %s582_s5, %s582_s5, %s583_s30  }
  0xc7 PF: > { %s271_s6 = sand.u32 1, %s565_s9   ;;  %p769_p12 = scmp.ge.s32.totalorder %s577_s12, 2 }
  0xc8   : > { %s272_s7 = scalar_lea.sflag [#allocation4], %s271_s6 }
  0xc9   : > { %p403_p13 = pnand %p769_p12, %p634_p6 }
  0xcb   : > { %p404_p0 = pneg %p403_p13 }
  0xcd   : > { %560 = dma.done.wait (%p404_p0), %s272_s7, 512  }
  0xce   : > { %562 = vsyncadd (%p404_p0), %s272_s7, 4294966784  ;;  %p16_p5 = scmp.ge.s32.totalorder %s652_s23, 4   ;;  %s770_s9 = smov %s569_s10 }
  0xcf   : > { %s771_s10 = smov %s573_s11  ;;  %s772_s11 = smov %s664_s28 }
  0xd0   : > { %s773_s12 = smov %s652_s23  ;;  %18 = sbr.rel (!%p16_p5) target bundleno = 6 (0x6), region = 77 }
  0xd5   :  { %278 = vsyncpa [#allocation3], 1 }
  0xd6   :  { %280 = vsyncpa [#allocation3 + $0x1], 1 }
  0xd7   :  { %281 = vsyncpa [#allocation6], 1 }
  0xd8   :  { %282 = vsyncpa [#allocation4], 1 }
  0xd9   :  { %284 = vsyncpa [#allocation4 + $0x1], 1 }

</bundles_post_ra>
